<compile_context>
chip_gen: v7x
topology: tpu7x:2x2x1
jax: 0.10.0
libtpu: 0.0.40
codegen_flags: <defaults>
</compile_context>

<pallas_src>
import jax
import jax.numpy as jnp
from jax.experimental import pallas as pl
from jax.experimental.pallas import tpu as pltpu

P_VALUE = 1e-8


def _round_up(v, m):
    return ((v + m - 1) // m) * m


# ----------------------------------------------------------------------------
# C == 1 fast path: fully dense 2-D elementwise kernel, sigmoid identity.
# ----------------------------------------------------------------------------
def _gumbel_sigmoid_c1_kernel(inv_t_ref, x_ref, u_ref, o_ref):
    # x_ref: (BR, LW), u_ref: (2, BR, LW), o_ref: (BR, LW); inv_t_ref: SMEM (1,)
    inv_t = inv_t_ref[0]
    x = x_ref[...]
    g = -jnp.log(-jnp.log(u_ref[...] + P_VALUE) + P_VALUE)     # (2, BR, LW)
    xt = (jnp.log(x + P_VALUE) + g[0]) * inv_t
    rt = (jnp.log((1.0 - x) + P_VALUE) + g[1]) * inv_t
    # softmax([xt, rt]) channel 0  ==  sigmoid(xt - rt)  (exact identity)
    o_ref[...] = 1.0 / (1.0 + jnp.exp(rt - xt))


def _gumbel_sigmoid_c1(x, u, inv_t, *, lane=512, max_block_rows=256):
    N, C, H, W = x.shape
    T = N * H * W
    lane = max(128, min(lane, _round_up(T, 128)))
    rows = _round_up(pl.cdiv(T, lane), 8)
    block_rows = min(rows, max_block_rows)
    rows = _round_up(rows, block_rows)
    total = rows * lane

    x_flat = jnp.pad(x.reshape(-1).astype(jnp.float32),
                     (0, total - T)).reshape(rows, lane)
    u_flat = jnp.pad(u.reshape(2, -1).astype(jnp.float32),
                     ((0, 0), (0, total - T)),
                     constant_values=0.5).reshape(2, rows, lane)

    out = pl.pallas_call(
        _gumbel_sigmoid_c1_kernel,
        out_shape=jax.ShapeDtypeStruct((rows, lane), jnp.float32),
        grid_spec=pltpu.PrefetchScalarGridSpec(
            num_scalar_prefetch=1,
            grid=(rows // block_rows,),
            in_specs=[
                pl.BlockSpec((block_rows, lane), lambda i, s: (i, 0)),
                pl.BlockSpec((2, block_rows, lane), lambda i, s: (0, i, 0)),
            ],
            out_specs=pl.BlockSpec((block_rows, lane), lambda i, s: (i, 0)),
        ),
        compiler_params=pltpu.CompilerParams(
            dimension_semantics=("parallel",)),
    )(inv_t, x_flat, u_flat)

    return out.reshape(-1)[:T].reshape(N, 1, H, W)


# ----------------------------------------------------------------------------
# General C path: softmax over the 2C concatenated channels (sublane axis).
# ----------------------------------------------------------------------------
def _gumbel_sigmoid_softmax_kernel(inv_t_ref, x_ref, u_ref, o_ref):
    # x_ref: (1, C, Lt), u_ref: (1, 2C, Lt), o_ref: (1, 1, Lt)
    inv_t = inv_t_ref[0]
    x = x_ref[0]                   # (C, Lt)
    u = u_ref[0]                   # (2C, Lt)
    c = x.shape[0]
    g = -jnp.log(-jnp.log(u + P_VALUE) + P_VALUE)
    xt = (jnp.log(x + P_VALUE) + g[:c]) * inv_t
    rt = (jnp.log((1.0 - x) + P_VALUE) + g[c:]) * inv_t
    m = jnp.maximum(jnp.max(xt, axis=0, keepdims=True),
                    jnp.max(rt, axis=0, keepdims=True))
    ex = jnp.exp(xt - m)
    er = jnp.exp(rt - m)
    denom = jnp.sum(ex, axis=0, keepdims=True) + jnp.sum(er, axis=0, keepdims=True)
    o_ref[0] = ex[0:1, :] / denom


def _gumbel_sigmoid_general(x, u, inv_t, *, l_tile=2048):
    N, C, H, W = x.shape
    L = H * W
    l_tile = max(128, min(l_tile, _round_up(L, 128)))
    L_pad = _round_up(L, l_tile)

    x_flat = x.reshape(N, C, L).astype(jnp.float32)
    u_flat = u.reshape(2, N, C, L).astype(jnp.float32)
    u_cat = jnp.concatenate([u_flat[0], u_flat[1]], axis=1)   # (N, 2C, L)
    if L_pad != L:
        x_flat = jnp.pad(x_flat, ((0, 0), (0, 0), (0, L_pad - L)))
        u_cat = jnp.pad(u_cat, ((0, 0), (0, 0), (0, L_pad - L)),
                        constant_values=0.5)

    out = pl.pallas_call(
        _gumbel_sigmoid_softmax_kernel,
        out_shape=jax.ShapeDtypeStruct((N, 1, L_pad), jnp.float32),
        grid_spec=pltpu.PrefetchScalarGridSpec(
            num_scalar_prefetch=1,
            grid=(N, L_pad // l_tile),
            in_specs=[
                pl.BlockSpec((1, C, l_tile), lambda n, l, s: (n, 0, l)),
                pl.BlockSpec((1, 2 * C, l_tile), lambda n, l, s: (n, 0, l)),
            ],
            out_specs=pl.BlockSpec((1, 1, l_tile), lambda n, l, s: (n, 0, l)),
        ),
        compiler_params=pltpu.CompilerParams(
            dimension_semantics=("parallel", "parallel")),
    )(inv_t, x_flat, u_cat)

    return out[:, :, :L].reshape(N, 1, H, W)


def gumbel_sigmoid(x, u, *, cur_T):
    """GumbelSigmoid forward.

    x: (N, C, H, W) probabilities in [0, 1]
    u: (2, N, C, H, W) uniforms in [0, 1) (u[0] -> x-noise, u[1] -> r-noise)
    cur_T: current temperature (python float or jnp scalar; passed via SMEM,
           so changing it does not trigger recompilation).
    Returns (N, 1, H, W) float32.
    """
    assert u.shape == (2,) + x.shape
    inv_t = (1.0 / (jnp.asarray(cur_T, jnp.float32) + P_VALUE)).reshape(1)
    N, C, H, W = x.shape
    if C == 1:
        return _gumbel_sigmoid_c1(x, u, inv_t)
    return _gumbel_sigmoid_general(x, u, inv_t)


# Pure-JAX reference (mirrors the PyTorch forward exactly, given the same u).
def _reference(x, u, cur_T):
    p = P_VALUE
    xl = jnp.log(x + p)
    rl = jnp.log((1.0 - x) + p)
    g = -jnp.log(-jnp.log(u + p) + p)
    xt = (xl + g[0]) / (cur_T + p)
    rt = (rl + g[1]) / (cur_T + p)
    logits = jnp.concatenate([xt, rt], axis=1)
    sm = jax.nn.softmax(logits, axis=1)
    return sm[:, 0:1, :, :]


if __name__ == "__main__":
    key = jax.random.PRNGKey(0)
    k1, k2, k3, k4 = jax.random.split(key, 4)

    max_T = 1.0
    decay_alpha = 0.998
    cur_T = max_T  # TODO(synk): training-time decay (cur_T *= decay_alpha per step) is host-side Python state, not tensor math.

    # Primary use-case: single-channel soft spatial mask (C == 1 fast path).
    N, C, H, W = 2, 1, 16, 16
    x1 = jax.random.uniform(k1, (N, C, H, W), dtype=jnp.float32)
    u1 = jax.random.uniform(k2, (2, N, C, H, W), dtype=jnp.float32)
    y1 = gumbel_sigmoid(x1, u1, cur_T=cur_T)
    jax.block_until_ready(y1)
    r1 = _reference(x1, u1, cur_T)
    assert y1.shape == (N, 1, H, W) and y1.dtype == jnp.float32
    assert bool(jnp.all(jnp.isfinite(y1)))
    assert bool(jnp.all((y1 >= 0.0) & (y1 <= 1.0)))
    assert bool(jnp.allclose(y1, r1, atol=2e-3, rtol=2e-3))

    # General multi-channel path (softmax over the 2C concatenated channels).
    N2, C2, H2, W2 = 2, 4, 16, 16
    x2 = jax.random.uniform(k3, (N2, C2, H2, W2), dtype=jnp.float32)
    u2 = jax.random.uniform(k4, (2, N2, C2, H2, W2), dtype=jnp.float32)
    y2 = gumbel_sigmoid(x2, u2, cur_T=cur_T)
    jax.block_until_ready(y2)
    r2 = _reference(x2, u2, cur_T)
    assert y2.shape == (N2, 1, H2, W2)
    assert bool(jnp.all(jnp.isfinite(y2)))
    assert bool(jnp.allclose(y2, r2, atol=2e-3, rtol=2e-3))

    print("KERNEL_OK")
</pallas_src>

<mosaic_0001>
module attributes {stable_mosaic.version = 11 : i64} {
  func.func @_gumbel_sigmoid_c1_kernel(%arg0: i32, %arg1: memref<1xf32, #tpu.memory_space<smem>>, %arg2: memref<8x512xf32, #tpu.memory_space<vmem>>, %arg3: memref<2x8x512xf32, #tpu.memory_space<vmem>>, %arg4: memref<8x512xf32, #tpu.memory_space<vmem>>) attributes {dimension_semantics = [#tpu.dimension_semantics<parallel>], iteration_bounds = array<i64: 1>, scalar_prefetch = 1 : i64, scratch_operands = 0 : i64, tpu.core_type = #tpu.core_type<tc>, window_params = [{transform_indices = @transform_0, window_bounds = array<i64: 8, 512>}, {transform_indices = @transform_1, window_bounds = array<i64: 2, 8, 512>}, {transform_indices = @transform_2, window_bounds = array<i64: 8, 512>}]} {
    %c0 = arith.constant 0 : index
    %0 = memref.load %arg1[%c0] : memref<1xf32, #tpu.memory_space<smem>>
    %c0_0 = arith.constant 0 : index
    %c0_1 = arith.constant 0 : index
    %1 = vector.load %arg2[%c0_0, %c0_1] : memref<8x512xf32, #tpu.memory_space<vmem>>, vector<8x512xf32>
    %c0_2 = arith.constant 0 : index
    %c0_3 = arith.constant 0 : index
    %c0_4 = arith.constant 0 : index
    %2 = vector.load %arg3[%c0_2, %c0_3, %c0_4] : memref<2x8x512xf32, #tpu.memory_space<vmem>>, vector<2x8x512xf32>
    %cst = arith.constant 9.99999993E-9 : f32
    %3 = vector.broadcast %cst : f32 to vector<2x8x512xf32>
    %4 = arith.addf %2, %3 : vector<2x8x512xf32>
    %5 = math.log %4 : vector<2x8x512xf32>
    %cst_5 = arith.constant 0.000000e+00 : f32
    %6 = vector.broadcast %cst_5 : f32 to vector<2x8x512xf32>
    %7 = arith.subf %6, %5 : vector<2x8x512xf32>
    %cst_6 = arith.constant 9.99999993E-9 : f32
    %8 = vector.broadcast %cst_6 : f32 to vector<2x8x512xf32>
    %9 = arith.addf %7, %8 : vector<2x8x512xf32>
    %10 = math.log %9 : vector<2x8x512xf32>
    %cst_7 = arith.constant 0.000000e+00 : f32
    %11 = vector.broadcast %cst_7 : f32 to vector<2x8x512xf32>
    %12 = arith.subf %11, %10 : vector<2x8x512xf32>
    %cst_8 = arith.constant 9.99999993E-9 : f32
    %13 = vector.broadcast %cst_8 : f32 to vector<8x512xf32>
    %14 = arith.addf %1, %13 : vector<8x512xf32>
    %15 = math.log %14 : vector<8x512xf32>
    %16 = vector.extract_strided_slice %12 {offsets = [0, 0, 0], sizes = [1, 8, 512], strides = [1, 1, 1]} : vector<2x8x512xf32> to vector<1x8x512xf32>
    %17 = vector.shape_cast %16 : vector<1x8x512xf32> to vector<8x512xf32>
    %18 = arith.addf %15, %17 : vector<8x512xf32>
    %19 = vector.broadcast %0 : f32 to vector<8x512xf32>
    %20 = arith.mulf %18, %19 : vector<8x512xf32>
    %cst_9 = arith.constant 1.000000e+00 : f32
    %21 = vector.broadcast %cst_9 : f32 to vector<8x512xf32>
    %22 = arith.subf %21, %1 : vector<8x512xf32>
    %cst_10 = arith.constant 9.99999993E-9 : f32
    %23 = vector.broadcast %cst_10 : f32 to vector<8x512xf32>
    %24 = arith.addf %22, %23 : vector<8x512xf32>
    %25 = math.log %24 : vector<8x512xf32>
    %26 = vector.extract_strided_slice %12 {offsets = [1, 0, 0], sizes = [1, 8, 512], strides = [1, 1, 1]} : vector<2x8x512xf32> to vector<1x8x512xf32>
    %27 = vector.shape_cast %26 : vector<1x8x512xf32> to vector<8x512xf32>
    %28 = arith.addf %25, %27 : vector<8x512xf32>
    %29 = vector.broadcast %0 : f32 to vector<8x512xf32>
    %30 = arith.mulf %28, %29 : vector<8x512xf32>
    %31 = arith.subf %30, %20 : vector<8x512xf32>
    %32 = math.exp %31 : vector<8x512xf32>
    %cst_11 = arith.constant 1.000000e+00 : f32
    %33 = vector.broadcast %cst_11 : f32 to vector<8x512xf32>
    %34 = arith.addf %33, %32 : vector<8x512xf32>
    %cst_12 = arith.constant 1.000000e+00 : f32
    %35 = vector.broadcast %cst_12 : f32 to vector<8x512xf32>
    %36 = arith.divf %35, %34 : vector<8x512xf32>
    %c0_13 = arith.constant 0 : index
    %c0_14 = arith.constant 0 : index
    %37 = vector.load %arg4[%c0_13, %c0_14] : memref<8x512xf32, #tpu.memory_space<vmem>>, vector<8x512xf32>
    tpu.vector_store %arg4[%c0_13, %c0_14], %36 {strides = array<i32>} : memref<8x512xf32, #tpu.memory_space<vmem>>, vector<8x512xf32>,
    return
  }
  func.func @transform_0(%arg0: i32, %arg1: memref<1xf32, #tpu.memory_space<smem>>) -> (i32, i32) {
    %c0_i32 = arith.constant 0 : i32
    %c0_i32_0 = arith.constant 0 : i32
    return %arg0, %c0_i32 : i32, i32
  }
  func.func @transform_1(%arg0: i32, %arg1: memref<1xf32, #tpu.memory_space<smem>>) -> (i32, i32, i32) {
    %c0_i32 = arith.constant 0 : i32
    %c0_i32_0 = arith.constant 0 : i32
    %c0_i32_1 = arith.constant 0 : i32
    return %c0_i32, %arg0, %c0_i32_0 : i32, i32, i32
  }
  func.func @transform_2(%arg0: i32, %arg1: memref<1xf32, #tpu.memory_space<smem>>) -> (i32, i32) {
    %c0_i32 = arith.constant 0 : i32
    %c0_i32_0 = arith.constant 0 : i32
    return %arg0, %c0_i32 : i32, i32
  }
}

</mosaic_0001>

<bundles_post_ra>
// kernel: tpu_custom_call.1
= control target key start
LH: loop header
LB: loop body
LE: loop exit
PB: predicated region body
PF: predicated region fallthrough
CT: control target
= control target key end

     0   :  { %9 = vsyncpa [#allocation5], 0  ;;  %s418_s0 = inlined_call_operand.<no memory space> [shape: f32[1], index: 0, kind: input, shape index: {}]   ;;  %s419_s1 = inlined_call_operand.hbm [shape: f32[8,512], index: 1, kind: input, shape index: {}]   ;;  %s420_s2 = inlined_call_operand.hbm [shape: f32[2,8,512], index: 2, kind: input, shape index: {}]   ;;  %s421_s3 = inlined_call_operand.hbm [shape: f32[8,512], index: 3, kind: output, shape index: {}]  }
   0x1   :  { %10 = vsyncpa [#allocation8], 0 }
   0x2   :  { %11 = vsyncpa [#allocation6], 0  ;;  %s347_s12 = smov [#allocation4]   ;;  %s348_s14 = smov [#allocation7]  }
   0x3   :  { %s18_s13 = sshll.u32 %s347_s12, 4  ;;  %s27_s15 = sshll.u32 %s348_s14, 4  ;;  %s19_s13 = int_to_ptr.vmem [resolvable:$true] %s18_s13  ;;  %s372_s15 = int_to_ptr.vmem [resolvable:$true] %s27_s15 }
   0x4   :  { %s275_s18 = scalar_lea.hbm %s419_s1, 512 }
   0x5   :  { %p276_p0 = scmp.ne.s32.totalorder %s419_s1, %s275_s18  ;;  %p279_p1 = scmp.lt.u32.totalorder %s275_s18, %s419_s1 }
   0x7   :  { %p281_p2 = pnand %p279_p1, %p276_p0 }
   0x9   :  { %284 = shalt.err (!%p281_p2)
}
   0xa   :  { %s285_s23 = scalar_lea.vmem %s19_s13, 512  ;;  %p290_p4 = scmp.lt.s32.totalorder %s19_s13, %s19_s13 }
   0xb   :  { %p286_p3 = scmp.ne.s32.totalorder %s19_s13, %s285_s23  ;;  %p291_p5 = scmp.lt.s32.totalorder %s285_s23, %s285_s23 }
   0xd   :  { %p292_p6 = por %p291_p5, %p290_p4 }
   0xf   :  { %p293_p7 = pnand %p292_p6, %p286_p3 }
  0x11   :  { %296 = shalt.err (!%p293_p7)
}
  0x12   :  { %21 = dma.hbm_to_vmem [thread:$0]  %s419_s1, 512, %s19_s13, [#allocation5]  }
  0x13   :  { %s297_s28 = scalar_lea.hbm %s420_s2, 1024 }
  0x14   :  { %p298_p8 = scmp.ne.s32.totalorder %s420_s2, %s297_s28  ;;  %p301_p9 = scmp.lt.u32.totalorder %s297_s28, %s420_s2 }
  0x16   :  { %p303_p10 = pnand %p301_p9, %p298_p8 }
  0x18   :  { %306 = shalt.err (!%p303_p10)
}
  0x19   :  { %s307_s6 = scalar_lea.vmem %s372_s15, 1024  ;;  %p312_p12 = scmp.lt.s32.totalorder %s372_s15, %s372_s15 }
  0x1a   :  { %p308_p11 = scmp.ne.s32.totalorder %s372_s15, %s307_s6  ;;  %p313_p13 = scmp.lt.s32.totalorder %s307_s6, %s307_s6 }
  0x1c   :  { %p314_p0 = por %p313_p13, %p312_p12 }
  0x1e   :  { %p315_p1 = pnand %p314_p0, %p308_p11 }
  0x20   :  { %318 = shalt.err (!%p315_p1)
}
  0x21   :  { %s349_s1 = smov 512   ;;  %s350_s7 = smov 32  }
  0x22   :  { %33 = dma.hbm_to_vmem [thread:$0]  %s420_s2, 1024, %s372_s15, [#allocation8], %s349_s1, %s349_s1, %s350_s7  }
  0x23   :  { %341 = dma.done.wait [#allocation5], 512  }
  0x24   :  { %342 = vsyncadd [#allocation5], 4294966784 }
  0x25   :  { %343 = dma.done.wait [#allocation8], 1024  }
  0x26   :  { %344 = vsyncadd [#allocation8], 4294966272  ;;  %v45_v0 = vld [vmem:[#allocation7] sm:$0xff]  ;;  %v46_v4 = vld [vmem:[#allocation7 + $0x8] sm:$0xff] }
  0x27   :  { %v49_v1 = vld [vmem:[#allocation7 + $0x20] sm:$0xff]  ;;  %v53_v2 = vadd.f32 1e-08, %v45_v0  ;;  %v50_v5 = vld [vmem:[#allocation7 + $0x28] sm:$0xff]  ;;  %v54_v6 = vadd.f32 1e-08, %v46_v4 }
  0x28   :  { %v57_v3 = vadd.f32 1e-08, %v49_v1  ;;  %v58_v7 = vadd.f32 1e-08, %v50_v5  ;;  %v47_v8 = vld [vmem:[#allocation7 + $0x10] sm:$0xff]  ;;  %v41_v10 = vld [vmem:[#allocation4] sm:$0xff] }
  0x29   :  { %211 = vlog2.f32 %v53_v2  ;;  %v51_v9 = vld [vmem:[#allocation7 + $0x30] sm:$0xff]  ;;  %v55_v11 = vadd.f32 1e-08, %v47_v8  ;;  %v48_v13 = vld [vmem:[#allocation7 + $0x18] sm:$0xff]  ;;  %v138_v15 = vsub.f32 1.0, %v41_v10  ;;  %v42_v16 = vld [vmem:[#allocation4 + $0x8] sm:$0xff] }
  0x2a   :  { %213 = vlog2.f32 %v57_v3  ;;  %v59_v12 = vadd.f32 1e-08, %v51_v9  ;;  %v52_v14 = vld [vmem:[#allocation7 + $0x38] sm:$0xff]  ;;  %v56_v17 = vadd.f32 1e-08, %v48_v13  ;;  %v139_v24 = vsub.f32 1.0, %v42_v16 }
  0x2b   :  { %215 = vlog2.f32 %v54_v6  ;;  %v60_v18 = vadd.f32 1e-08, %v52_v14  ;;  %v117_v20 = vadd.f32 1e-08, %v41_v10  ;;  %v142_v23 = vadd.f32 1e-08, %v138_v15 }
  0x2c   :  { %217 = vlog2.f32 %v58_v7  ;;  %v43_v25 = vld [vmem:[#allocation4 + $0x10] sm:$0xff]  ;;  %v118_v27 = vadd.f32 1e-08, %v42_v16  ;;  %v143_v36 = vadd.f32 1e-08, %v139_v24  ;;  %v44_v39 = vld [vmem:[#allocation4 + $0x18] sm:$0xff]  ;;  %v133_v14 = vstv %s418_s0 }
  0x2d   :  { %219 = vlog2.f32 %v55_v11  ;;  %v119_v31 = vadd.f32 1e-08, %v43_v25  ;;  %v140_v32 = vsub.f32 1.0, %v43_v25  ;;  %v141_v47 = vsub.f32 1.0, %v44_v39  ;;  %s351_s0 = smov [#allocation9]  }
  0x2e   :  { %221 = vlog2.f32 %v59_v12  ;;  %v120_v50 = vadd.f32 1e-08, %v44_v39  ;;  %s196_s11 = sshll.u32 %s351_s0, 4  ;;  %s197_s11 = int_to_ptr.vmem [resolvable:$true] %s196_s11 }
  0x2f   :  { %223 = vlog2.f32 %v56_v17  ;;  %v144_v43 = vadd.f32 1e-08, %v140_v32  ;;  %v145_v57 = vadd.f32 1e-08, %v141_v47  ;;  %s319_s12 = scalar_lea.vmem %s197_s11, 512  ;;  %p324_p3 = scmp.lt.s32.totalorder %s197_s11, %s197_s11 }
  0x30   :  { %225 = vlog2.f32 %v60_v18  ;;  %p320_p2 = scmp.ne.s32.totalorder %s197_s11, %s319_s12  ;;  %p325_p4 = scmp.lt.s32.totalorder %s319_s12, %s319_s12 }
  0x31   :  { %227 = vlog2.f32 %v117_v20 }
  0x32   :  { %229 = vlog2.f32 %v142_v23  ;;  %p326_p5 = por %p325_p4, %p324_p3 }
  0x33   :  { %v212_v19 = vpop.eup %211  ;;  %231 = vlog2.f32 %v118_v27 }
  0x34   :  { %v214_v21 = vpop.eup %213  ;;  %v62_v22 = vmul.f32 0.6931472, %v212_v19  ;;  %p327_p6 = pnand %p326_p5, %p320_p2 }
  0x35   :  { %v70_v26 = vmul.f32 0.6931472, %v214_v21  ;;  %v216_v29 = vpop.eup %215 }
  0x36   :  { %v77_v28 = vsub.f32 0.0, %v62_v22  ;;  %v218_v33 = vpop.eup %217  ;;  %v64_v35 = vmul.f32 0.6931472, %v216_v29 }
  0x37   :  { %v81_v30 = vsub.f32 0.0, %v70_v26  ;;  %v72_v38 = vmul.f32 0.6931472, %v218_v33  ;;  %v220_v41 = vpop.eup %219 }
  0x38   :  { %v85_v34 = vadd.f32 1e-08, %v77_v28  ;;  %v78_v40 = vsub.f32 0.0, %v64_v35  ;;  %v222_v44 = vpop.eup %221  ;;  %v66_v46 = vmul.f32 0.6931472, %v220_v41 }
  0x39   :  { %v89_v37 = vadd.f32 1e-08, %v81_v30  ;;  %v82_v42 = vsub.f32 0.0, %v72_v38  ;;  %v74_v49 = vmul.f32 0.6931472, %v222_v44  ;;  %v224_v52 = vpop.eup %223 }
  0x3a   :  { %233 = vlog2.f32 %v85_v34  ;;  %v86_v45 = vadd.f32 1e-08, %v78_v40  ;;  %v79_v51 = vsub.f32 0.0, %v66_v46  ;;  %v226_v54 = vpop.eup %225  ;;  %v68_v56 = vmul.f32 0.6931472, %v224_v52 }
  0x3b   :  { %235 = vlog2.f32 %v89_v37  ;;  %v90_v48 = vadd.f32 1e-08, %v82_v42  ;;  %v83_v53 = vsub.f32 0.0, %v74_v49  ;;  %v228_v58 = vpop.eup %227  ;;  %v76_v60 = vmul.f32 0.6931472, %v226_v54 }
  0x3c   :  { %237 = vlog2.f32 %v143_v36  ;;  %v87_v55 = vadd.f32 1e-08, %v79_v51  ;;  %v230_v61 = vpop.eup %229  ;;  %v80_v62 = vsub.f32 0.0, %v68_v56  ;;  %v122_v5 = vmul.f32 0.6931472, %v228_v58 }
  0x3d   :  { %239 = vlog2.f32 %v119_v31  ;;  %v91_v59 = vadd.f32 1e-08, %v83_v53  ;;  %v232_v63 = vpop.eup %231  ;;  %v84_v0 = vsub.f32 0.0, %v76_v60  ;;  %v147_v9 = vmul.f32 0.6931472, %v230_v61 }
  0x3e   :  { %241 = vlog2.f32 %v86_v45  ;;  %v88_v2 = vadd.f32 1e-08, %v80_v62  ;;  %v124_v18 = vmul.f32 0.6931472, %v232_v63 }
  0x3f   :  { %243 = vlog2.f32 %v90_v48  ;;  %v92_v6 = vadd.f32 1e-08, %v84_v0 }
  0x40   :  { %245 = vlog2.f32 %v144_v43 }
  0x41   :  { %247 = vlog2.f32 %v120_v50 }
  0x42   :  { %249 = vlog2.f32 %v87_v55 }
  0x43   :  { %251 = vlog2.f32 %v91_v59 }
  0x44   :  { %v234_v1 = vpop.eup %233  ;;  %253 = vlog2.f32 %v145_v57 }
  0x45   :  { %v236_v3 = vpop.eup %235  ;;  %v94_v4 = vmul.f32 0.6931472, %v234_v1  ;;  %255 = vlog2.f32 %v88_v2 }
  0x46   :  { %v238_v7 = vpop.eup %237  ;;  %v102_v8 = vmul.f32 0.6931472, %v236_v3  ;;  %257 = vlog2.f32 %v92_v6 }
  0x47   :  { %v240_v10 = vpop.eup %239  ;;  %v109_v11 = vsub.f32 0.0, %v94_v4  ;;  %v149_v22 = vmul.f32 0.6931472, %v238_v7 }
  0x48   :  { %v242_v12 = vpop.eup %241  ;;  %v113_v13 = vsub.f32 0.0, %v102_v8  ;;  %v126_v32 = vmul.f32 0.6931472, %v240_v10 }
  0x49   :  { %v244_v15 = vpop.eup %243  ;;  %v129_v16 = vadd.f32 %v122_v5, %v109_v11  ;;  %v96_v17 = vmul.f32 0.6931472, %v242_v12 }
  0x4a   :  { %v246_v19 = vpop.eup %245  ;;  %v154_v20 = vadd.f32 %v147_v9, %v113_v13  ;;  %v104_v21 = vmul.f32 0.6931472, %v244_v15 }
  0x4b   :  { %v248_v23 = vpop.eup %247  ;;  %v134_v24 = vmul.f32 %v133_v14, %v129_v16  ;;  %v110_v25 = vsub.f32 0.0, %v96_v17  ;;  %v151_v37 = vmul.f32 0.6931472, %v246_v19 }
  0x4c   :  { %v250_v26 = vpop.eup %249  ;;  %v158_v27 = vmul.f32 %v154_v20, %v133_v14  ;;  %v114_v28 = vsub.f32 0.0, %v104_v21  ;;  %v128_v47 = vmul.f32 0.6931472, %v248_v23 }
  0x4d   :  { %v252_v29 = vpop.eup %251  ;;  %v130_v30 = vadd.f32 %v124_v18, %v110_v25  ;;  %v98_v31 = vmul.f32 0.6931472, %v250_v26 }
  0x4e   :  { %v254_v33 = vpop.eup %253  ;;  %v162_v34 = vsub.f32 %v158_v27, %v134_v24  ;;  %v155_v35 = vadd.f32 %v149_v22, %v114_v28  ;;  %v106_v36 = vmul.f32 0.6931472, %v252_v29 }
  0x4f   :  { %v135_v38 = vmul.f32 %v133_v14, %v130_v30  ;;  %v111_v39 = vsub.f32 0.0, %v98_v31  ;;  %v256_v40 = vpop.eup %255  ;;  %v153_v48 = vmul.f32 0.6931472, %v254_v33 }
  0x50   :  { %v166_v41 = vmul.f32 1.442695, %v162_v34  ;;  %v159_v42 = vmul.f32 %v155_v35, %v133_v14  ;;  %v115_v43 = vsub.f32 0.0, %v106_v36  ;;  %v258_v44 = vpop.eup %257  ;;  %v100_v46 = vmul.f32 0.6931472, %v256_v40 }
  0x51   :  { %v131_v45 = vadd.f32 %v126_v32, %v111_v39  ;;  %v108_v51 = vmul.f32 0.6931472, %v258_v44 }
  0x52   :  { %259 = vpow2.f32 %v166_v41  ;;  %v163_v49 = vsub.f32 %v159_v42, %v135_v38  ;;  %v156_v50 = vadd.f32 %v151_v37, %v115_v43  ;;  %v112_v53 = vsub.f32 0.0, %v100_v46 }
  0x53   :  { %v136_v52 = vmul.f32 %v133_v14, %v131_v45  ;;  %v116_v56 = vsub.f32 0.0, %v108_v51 }
  0x54   :  { %v168_v54 = vmul.f32 1.442695, %v163_v49  ;;  %v160_v55 = vmul.f32 %v156_v50, %v133_v14  ;;  %v132_v57 = vadd.f32 %v128_v47, %v112_v53 }
  0x55   :  { %v157_v59 = vadd.f32 %v153_v48, %v116_v56 }
  0x56   :  { %261 = vpow2.f32 %v168_v54  ;;  %v164_v58 = vsub.f32 %v160_v55, %v136_v52  ;;  %v137_v60 = vmul.f32 %v133_v14, %v132_v57 }
  0x57   :  { %v161_v62 = vmul.f32 %v157_v59, %v133_v14 }
  0x58   :  { %v170_v61 = vmul.f32 1.442695, %v164_v58 }
  0x59   :  { %v165_v63 = vsub.f32 %v161_v62, %v137_v60 }
  0x5a   :  { %263 = vpow2.f32 %v170_v61 }
  0x5b   :  { %v172_v1 = vmul.f32 1.442695, %v165_v63 }
  0x5c   :  { %v260_v0 = vpop.eup %259 }
  0x5d   :  { %v174_v2 = vadd.f32 1.0, %v260_v0  ;;  %265 = vpow2.f32 %v172_v1 }
  0x5f   :  { %267 = vrcp.f32 %v174_v2 }
  0x60   :  { %v262_v3 = vpop.eup %261 }
  0x61   :  { %v175_v4 = vadd.f32 1.0, %v262_v3 }
  0x63   :  { %269 = vrcp.f32 %v175_v4 }
  0x64   :  { %v264_v5 = vpop.eup %263 }
  0x65   :  { %v176_v6 = vadd.f32 1.0, %v264_v5 }
  0x67   :  { %271 = vrcp.f32 %v176_v6  ;;  %v266_v7 = vpop.eup %265 }
  0x68   :  { %v177_v9 = vadd.f32 1.0, %v266_v7 }
  0x69   :  { %v268_v8 = vpop.eup %267 }
  0x6a   :  { %186 = vst [vmem:[#allocation9] sm:$0xff] %v268_v8  ;;  %273 = vrcp.f32 %v177_v9 }
  0x6d   :  { %v270_v10 = vpop.eup %269 }
  0x6e   :  { %187 = vst [vmem:[#allocation9 + $0x8] sm:$0xff] %v270_v10 }
  0x71   :  { %v272_v11 = vpop.eup %271 }
  0x72   :  { %188 = vst [vmem:[#allocation9 + $0x10] sm:$0xff] %v272_v11 }
  0x74   :  { %v274_v12 = vpop.eup %273 }
  0x75   :  { %189 = vst [vmem:[#allocation9 + $0x18] sm:$0xff] %v274_v12 }
  0x76   :  { %330 = shalt.err (!%p327_p6)
}
  0x77   :  { %s331_s15 = scalar_lea.hbm %s421_s3, 512 }
  0x78   :  { %p332_p7 = scmp.ne.s32.totalorder %s421_s3, %s331_s15  ;;  %p335_p8 = scmp.lt.u32.totalorder %s331_s15, %s421_s3 }
  0x7a   :  { %p337_p9 = pnand %p335_p8, %p332_p7 }
  0x7c   :  { %340 = shalt.err (!%p337_p9)
}
  0x7d   :  { %199 = dma.vmem_to_hbm [thread:$0]  %s197_s11, 512, %s421_s3, [#allocation6]  }
  0x7e   :  { %345 = dma.done.wait [#allocation6], 512  }
  0x7f   :  { %346 = vsyncadd [#allocation6], 4294966784 }
  0x80   :  { %203 = vsyncpa [#allocation5], 1 }
  0x81   :  { %204 = vsyncpa [#allocation8], 1 }
  0x82   :  { %205 = vsyncpa [#allocation6], 1 }

</bundles_post_ra>
